<compile_context>
chip_gen: v5e
topology: v5e:2x2
jax: 0.10.0
libtpu: 0.0.40
codegen_flags: <defaults>
</compile_context>

<pallas_src>
import functools

import jax
import jax.numpy as jnp
from jax.experimental import pallas as pl
from jax.experimental.pallas import tpu as pltpu


# ~4 MiB per block: deep into the measured >=85%-of-roofline regime on all
# three generations; double-buffered (8 MiB + 16 KiB scratch) it stays under
# v5e's 16 MiB default scoped VMEM limit and far under v7x's 64 MiB VMEM.
_DEFAULT_BLOCK_BYTES = 4 * 1024 * 1024


def _sumsq_kernel(x_ref, out_ref, acc_ref, *, rows, tile_rows,
                  blocks_per_split, n_blocks):
    """Accumulate sum(x^2) over the inner (reduction) grid axis.

    Grid is (num_splits, blocks_per_split); axis 0 is 'parallel' (megacore /
    multi-TC sharding), axis 1 is 'arbitrary' (serial reduction). acc_ref is
    an (8, LANES) f32 VMEM accumulator; out_ref is a (1, 1) SMEM scalar per
    split.
    """
    if tile_rows % 8 != 0:
        # Tiny-input path: tile_rows == rows < one fold group, which implies a
        # single grid step (grid == (1, 1)); reduce the whole block directly.
        x = x_ref[...].astype(jnp.float32)
        out_ref[0, 0] = jnp.sum(x * x)
        return

    c = pl.program_id(0)
    i = pl.program_id(1)
    blk = c * blocks_per_split + i          # real (unclamped) block index

    @pl.when(i == 0)
    def _init():
        acc_ref[...] = jnp.zeros_like(acc_ref)

    def _accumulate(x):
        sq = x * x
        # Fold (tile_rows, LANES) -> (8, LANES): pure vreg adds, no XLU.
        acc_ref[...] += sq.reshape(tile_rows // 8, 8, sq.shape[-1]).sum(axis=0)

    last_block_ragged = (rows % tile_rows) != 0

    if last_block_ragged:
        # Fast path: full in-bounds blocks carry zero mask work per vreg.
        @pl.when(blk < n_blocks - 1)
        def _full():
            _accumulate(x_ref[...].astype(jnp.float32))

        # Only the single ragged last block pays the iota+compare+select.
        # (Overhanging clamped duplicates have blk > n_blocks - 1 -> skipped.)
        @pl.when(blk == n_blocks - 1)
        def _ragged():
            x = x_ref[...].astype(jnp.float32)
            start = (n_blocks - 1) * tile_rows          # static
            row_ids = jax.lax.broadcasted_iota(jnp.int32, x.shape, 0) + start
            # Mask BEFORE squaring so out-of-bounds garbage/NaN cannot
            # poison the accumulator.
            x = jnp.where(row_ids < rows, x, 0.0)
            _accumulate(x)
    else:
        # Rows divide evenly: every real block is full; only skip the VPU
        # work of the clamped duplicate overhang block (its DMA is
        # unavoidable via BlockSpec, the compute is not).
        @pl.when(blk < n_blocks)
        def _full():
            _accumulate(x_ref[...].astype(jnp.float32))

    @pl.when(i == pl.num_programs(1) - 1)
    def _finalize():
        # Single cross-lane (XLU) reduce + scalar SMEM store, epilogue only.
        out_ref[0, 0] = jnp.sum(acc_ref[...])


def _num_tensorcores() -> int:
    """Best-effort TensorCore count addressable by one kernel launch."""
    try:
        kind = jax.devices()[0].device_kind.lower()
    except Exception:
        return 1
    # Single-TC parts: v2/v3 cores, v5e ("v5 lite"), v6e ("v6 lite").
    if "lite" in kind or "v5e" in kind or "v6e" in kind or "v2" in kind or "v3" in kind:
        return 1
    # Multi-TC parts: v4 / v5p megacore, v7x (2 TCs per chip).
    if "v7" in kind or "tpu7" in kind or "v4" in kind or "v5p" in kind:
        return 2
    return 1


def _sum_of_squares(x: jax.Array, *, block_bytes: int = _DEFAULT_BLOCK_BYTES,
                    num_splits=None) -> jax.Array:
    """Pallas reduction: returns sum(x**2) as a float32 scalar."""
    total = x.size
    if total == 0:
        return jnp.float32(0.0)
    x_flat = x.reshape(-1)                       # contiguous: no HBM copy

    # Lane width: prefer 512, fall back to 256/128 so the common case stays
    # copy- and pad-free.
    lanes = None
    for cand in (512, 256, 128):
        if total % cand == 0:
            lanes = cand
            break
    if lanes is None:
        # Rare ragged case (total not a multiple of 128). Feeding a sliced
        # body into pallas_call would make XLA materialize a fresh HBM buffer
        # (~3x traffic), so do this bandwidth-bound reduction in plain JAX:
        # one read, already at roofline.
        xf = x_flat.astype(jnp.float32)
        return jnp.sum(xf * xf)

    rows = total // lanes
    x2d = x_flat.reshape(rows, lanes)            # contiguous: no HBM copy

    itemsize = jnp.dtype(x.dtype).itemsize
    # Tile by BYTES, not rows, so bf16 inputs and the 256/128-lane fallbacks
    # still move ~block_bytes per grid step (constant per-step overhead
    # amortization on every chip generation).
    tile_rows = max(8, (block_bytes // (lanes * itemsize)) // 8 * 8)
    if rows <= tile_rows:
        tile_rows = rows                         # single block (may be < 8 rows)
    n_blocks = pl.cdiv(rows, tile_rows)

    if num_splits is None:
        cores = _num_tensorcores()
        num_splits = cores if n_blocks >= cores else 1
    num_splits = max(1, min(int(num_splits), n_blocks))
    blocks_per_split = pl.cdiv(n_blocks, num_splits)

    kernel = functools.partial(
        _sumsq_kernel,
        rows=rows,
        tile_rows=tile_rows,
        blocks_per_split=blocks_per_split,
        n_blocks=n_blocks,
    )

    def in_index(c, i):
        blk = c * blocks_per_split + i
        # Clamp so an overhanging (skipped-in-kernel) block never indexes
        # past the end of the array.
        return (jnp.minimum(blk, n_blocks - 1), 0)

    partials = pl.pallas_call(
        kernel,
        out_shape=jax.ShapeDtypeStruct((num_splits, 1), jnp.float32),
        grid_spec=pltpu.PrefetchScalarGridSpec(
            num_scalar_prefetch=0,
            grid=(num_splits, blocks_per_split),
            in_specs=[pl.BlockSpec((tile_rows, lanes), in_index)],
            out_specs=pl.BlockSpec((1, 1), lambda c, i: (c, 0),
                                   memory_space=pltpu.MemorySpace.SMEM),
            scratch_shapes=[pltpu.VMEM((8, lanes), jnp.float32)],
        ),
        compiler_params=pltpu.CompilerParams(
            # TODO(synk): on v7x confirm via xprof that "parallel" shards the
            # split axis across both TensorCores; if not, switch to
            # pltpu.CORE_PARALLEL / pl.core_map.
            dimension_semantics=("parallel", "arbitrary"),
        ),
        cost_estimate=pl.CostEstimate(
            flops=2 * total,
            transcendentals=0,
            bytes_accessed=total * itemsize + num_splits * 4,
        ),
    )(x2d)

    return jnp.sum(partials)


def rgb_sparse_loss(occ_rgb: jax.Array, weight: float):
    """JAX/Pallas equivalent of RGBSparseLoss.forward.

    occ_rgb: NCHW array (the 'occ_rgb' entry of batch_out), f32 or bf16.
    Returns None if weight <= 0 (weight is a static Python number, matching
    the PyTorch module's constructor argument), else an f32 scalar.
    """
    if weight <= 0:
        return None
    N, C, H, W = occ_rgb.shape
    ssq = _sum_of_squares(occ_rgb)
    # mean over (N, H, W) of the channel-wise squared L2 norm
    rgb_loss_sparsity = ssq / jnp.float32(N * H * W)
    return jnp.float32(weight) * rgb_loss_sparsity


def _ref_loss(x, w):
    # Plain-JAX reference: matches weight * (torch.norm(x, dim=1) ** 2).mean()
    return jnp.float32(w) * jnp.mean(jnp.sum(x.astype(jnp.float32) ** 2, axis=1))


if __name__ == "__main__":
    key = jax.random.PRNGKey(0)
    weight = 0.5
    k0, k1, k2, k3 = jax.random.split(key, 4)

    # Primary small example matching the module's NCHW 'occ_rgb' input.
    occ_rgb = jax.random.normal(k0, (2, 4, 16, 16), dtype=jnp.float32)
    loss = jax.block_until_ready(rgb_sparse_loss(occ_rgb, weight))
    ref = _ref_loss(occ_rgb, weight)
    assert jnp.allclose(loss, ref, rtol=1e-5, atol=1e-6), (loss, ref)

    # bf16 input / non-pow2 spatial dims: 128-lane fallback + tiny-block path.
    x_bf16 = jax.random.normal(k1, (2, 3, 40, 24), dtype=jnp.bfloat16)
    loss2 = jax.block_until_ready(rgb_sparse_loss(x_bf16, weight))
    ref2 = _ref_loss(x_bf16, weight)
    assert jnp.allclose(loss2, ref2, rtol=1e-4, atol=1e-4), (loss2, ref2)

    # Multi-block reduction + ragged (masked) last block + 2-way split with a
    # skipped clamped duplicate block — exercised at a small shape by
    # shrinking the block size and forcing two splits.
    x_med = jax.random.normal(k2, (2, 4, 128, 100), dtype=jnp.float32)
    ssq = jax.block_until_ready(
        _sum_of_squares(x_med, block_bytes=64 * 1024, num_splits=2))
    ssq_ref = jnp.sum(x_med.astype(jnp.float32) ** 2)
    assert jnp.allclose(ssq, ssq_ref, rtol=1e-5, atol=1e-2), (ssq, ssq_ref)

    # total % 128 != 0 -> documented plain-JAX fallback (avoids hidden copy).
    x_odd = jax.random.normal(k3, (2, 3, 5, 7), dtype=jnp.float32)
    loss4 = jax.block_until_ready(rgb_sparse_loss(x_odd, weight))
    ref4 = _ref_loss(x_odd, weight)
    assert jnp.allclose(loss4, ref4, rtol=1e-5, atol=1e-5), (loss4, ref4)

    # weight <= 0 path returns None, like the PyTorch module.
    assert rgb_sparse_loss(occ_rgb, 0.0) is None

    print("KERNEL_OK")
</pallas_src>

<mosaic_0001>
module attributes {stable_mosaic.version = 11 : i64} {
  func.func @_sumsq_kernel(%arg0: i32, %arg1: i32, %arg2: memref<4x512xf32, #tpu.memory_space<vmem>>, %arg3: memref<1x1xf32, #tpu.memory_space<smem>>, %arg4: memref<8x512xf32, #tpu.memory_space<vmem>>) attributes {dimension_semantics = [#tpu.dimension_semantics<parallel>, #tpu.dimension_semantics<arbitrary>], iteration_bounds = array<i64: 1, 1>, scalar_prefetch = 0 : i64, scratch_operands = 1 : i64, tpu.core_type = #tpu.core_type<tc>, window_params = [{transform_indices = @transform_0, window_bounds = array<i64: 4, 512>}, {transform_indices = @transform_1, window_bounds = array<i64: 1, 1>}]} {
    %c0 = arith.constant 0 : index
    %c0_0 = arith.constant 0 : index
    %0 = vector.load %arg2[%c0, %c0_0] : memref<4x512xf32, #tpu.memory_space<vmem>>, vector<4x512xf32>
    %1 = arith.mulf %0, %0 : vector<4x512xf32>
    %2 = vector.shape_cast %1 : vector<4x512xf32> to vector<1x4x512xf32>
    %cst = arith.constant dense<0.000000e+00> : vector<1xf32>
    %3 = vector.multi_reduction <add>, %2, %cst [1, 2] : vector<1x4x512xf32> to vector<1xf32>
    %4 = vector.shape_cast %3 : vector<1xf32> to vector<1x1x1xf32>
    %5 = vector.extract %4[0, 0, 0] : f32 from vector<1x1x1xf32>
    %c0_1 = arith.constant 0 : index
    %c0_2 = arith.constant 0 : index
    %6 = memref.load %arg3[%c0_1, %c0_2] : memref<1x1xf32, #tpu.memory_space<smem>>
    memref.store %5, %arg3[%c0_1, %c0_2] : memref<1x1xf32, #tpu.memory_space<smem>>
    return
  }
  func.func @transform_0(%arg0: i32, %arg1: i32) -> (i32, i32) {
    %c1_i32 = arith.constant 1 : i32
    %0 = arith.muli %arg0, %c1_i32 : i32
    %1 = arith.addi %0, %arg1 : i32
    %c0_i32 = arith.constant 0 : i32
    %2 = arith.minsi %1, %c0_i32 : i32
    %c0_i32_0 = arith.constant 0 : i32
    %c0_i32_1 = arith.constant 0 : i32
    return %2, %c0_i32_0 : i32, i32
  }
  func.func @transform_1(%arg0: i32, %arg1: i32) -> (i32, i32) {
    %c0_i32 = arith.constant 0 : i32
    %c0_i32_0 = arith.constant 0 : i32
    return %arg0, %c0_i32 : i32, i32
  }
}

</mosaic_0001>

<bundles_post_ra>
// kernel: tpu_custom_call.1
= control target key start
LH: loop header
LB: loop body
LE: loop exit
PB: predicated region body
PF: predicated region fallthrough
CT: control target
= control target key end

     0   :  { %6 = vsyncpa [#allocation4], 0  ;;  %s148_s0 = inlined_call_operand.hbm [shape: f32[4,512], index: 0, kind: input, shape index: {}]   ;;  %s149_s1 = inlined_call_operand.hbm [shape: f32[1,1], index: 1, kind: output, shape index: {}]  }
   0x1   :  { %7 = vsyncpa [#allocation5], 0  ;;  %s19_s8 = sshll.u32 %s148_s0, 4  ;;  %s130_s9 = smov [#allocation3]   ;;  %s20_s8 = int_to_ptr.hbm [resolvable:$true] %s19_s8 }
   0x2   :  { %s21_s10 = sshll.u32 %s130_s9, 4  ;;  %s22_s10 = int_to_ptr.vmem [resolvable:$true] %s21_s10 }
   0x3   :  { %24 = dma.hbm_to_vmem [thread:$0]  %s20_s8, 256, %s22_s10, [#allocation4]  }
   0x4   :  { %126 = dma.done.wait [#allocation4], 256  }
   0x5   :  { %127 = vsyncadd [#allocation4], 4294967040  ;;  %v32_v0 = vld [vmem:[#allocation3] sm:$0xff]  ;;  %v33_v1 = vld [vmem:[#allocation3 + $0x8] sm:$0xff]  ;;  %vm49_vm0 = vcmask 1043456   ;;  %s73_s12 = sshll.u32 %s149_s1, 4  ;;  %s74_s12 = int_to_ptr.hbm [resolvable:$true] %s73_s12 }
   0x6   :  { %v34_v2 = vmul.f32 %v32_v0, %v32_v0  ;;  %v35_v3 = vmul.f32 %v33_v1, %v33_v1  ;;  %s131_s14 = smov [#allocation6]  }
   0x8   :  { %38 = vst [vmem:[#allocation1] ss:$2 sm:$0xff] %v34_v2 }
   0x9   :  { %40 = vst [vmem:[#allocation1 + $0x10] ss:$2 sm:$0xff] %v35_v3 }
   0xf   :  { %v41_v4 = vld.sshfl [vmem:[#allocation1] sm:$0xff pattern:$0x75316420]  ;;  %v42_v5 = vld.sshfl [vmem:[#allocation1 + $0x8] sm:$0xff pattern:$0x75316420] }
  0x10   :  { %v43_v6 = vld.sshfl [vmem:[#allocation1 + $0x10] sm:$0xff pattern:$0x75316420]  ;;  %v44_v7 = vld.sshfl [vmem:[#allocation1 + $0x18] sm:$0xff pattern:$0x75316420] }
  0x11   :  { %v50_v8 = vsel %vm49_vm0, %v41_v4, 0.0  ;;  %v51_v9 = vsel %vm49_vm0, %v42_v5, 0.0  ;;  %v53_v10 = vsel %vm49_vm0, %v43_v6, 0.0  ;;  %v55_v12 = vsel %vm49_vm0, %v44_v7, 0.0 }
  0x12   :  { %v52_v11 = vadd.f32 %v51_v9, %v50_v8 }
  0x14   :  { %v54_v13 = vadd.f32 %v53_v10, %v52_v11 }
  0x16   :  { %v56_v14 = vadd.f32 %v55_v12, %v54_v13 }
  0x18   :  { %57 = vadd.xlane.f32.xlu0 %v56_v14 }
  0x8b   :  { %v58_v15 = vpop.xlane.xlu0 %57 }
  0x8c   :  { %v59_v16 = vrot.slane %v58_v15, 4 }
  0x8e   :  { %v60_v17 = vadd.f32 %v59_v16, %v58_v15 }
  0x90   :  { %v61_v18 = vrot.slane %v60_v17, 2 }
  0x92   :  { %v62_v19 = vadd.f32 %v61_v18, %v60_v17 }
  0x94   :  { %v63_v20 = vrot.slane %v62_v19, 1 }
  0x96   :  { %v64_v21 = vadd.f32 %v63_v20, %v62_v19 }
  0x98   :  { %86 = vpush %v64_v21 }
  0xc9   :  { %s87_s13 = spop %86 }
  0xca   :  { %67 = sst [smem:[#allocation6]] %s87_s13 }
  0xcb   :  { %76 = dma.smem_to_hbm %s131_s14, 16, %s74_s12, [#allocation5]  }
  0xcc   :  { %128 = dma.done.wait [#allocation5], 16  }
  0xcd   :  { %129 = vsyncadd [#allocation5], 4294967280 }
  0xce   :  { %81 = sfence }
  0xcf   :  { %82 = vsyncpa [#allocation4], 1 }
  0xd0   :  { %83 = vsyncpa [#allocation5], 1 }

</bundles_post_ra>
